<compile_context>
chip_gen: v6e
topology: v6e:2x2x1
jax: 0.10.0
libtpu: 0.0.40
codegen_flags: <defaults>
</compile_context>

<pallas_src>
import jax
import jax.numpy as jnp
from jax.experimental import pallas as pl
from jax.experimental.pallas import tpu as pltpu


D_MODEL = 128
MAX_LEN = 5000


def make_positional_encoding(d_model: int, max_len: int) -> jnp.ndarray:
    """Deterministic sin/cos table, identical to the PyTorch __init__."""
    assert d_model % 2 == 0, "sin/cos interleave assumes even d_model"
    position = jnp.arange(0, max_len, dtype=jnp.float32)[:, None]            # (max_len, 1)
    div_term = jnp.exp(
        jnp.arange(0, d_model, 2, dtype=jnp.float32)
        * -(jnp.log(jnp.float32(10000.0)) / d_model)
    )                                                                         # (d_model/2,)
    angles = position * div_term                                              # (max_len, d_model/2)
    enc = jnp.zeros((max_len, d_model), dtype=jnp.float32)
    enc = enc.at[:, 0::2].set(jnp.sin(angles))
    enc = enc.at[:, 1::2].set(jnp.cos(angles))
    return enc                                                                # (max_len, d_model)


def _add_pe_kernel(x_ref, pe_ref, o_ref):
    # x_ref/o_ref: (TB, TS, D); pe_ref: (TS, D).  Leading-axis broadcast is a
    # free VPU pattern; explicit cast keeps non-f32 activations correct.
    o_ref[...] = (x_ref[...] + pe_ref[...][None, :, :]).astype(o_ref.dtype)


def _round_up(n: int, m: int) -> int:
    return ((n + m - 1) // m) * m


def _choose_tiles(B: int, S: int, D: int, itemsize: int):
    """Pick (TB, TS) under a conservative double-buffered VMEM budget."""
    # Minimum sublane multiple for the second-to-last dim depends on dtype
    # packing (f32 -> 8, bf16 -> 16, int8/fp8 -> 32).
    sub = 8 if itemsize >= 4 else (16 if itemsize == 2 else 32)
    budget = 12 * 1024 * 1024  # stays under v5e's 16 MiB default scoped VMEM

    TS = min(2048, _round_up(S, sub))
    TB = min(B, 4)

    def bytes_needed(tb, ts):
        # 2x buffering of: x tile + out tile (activation dtype) + PE tile (f32)
        return 2 * (2 * tb * ts * D * itemsize + ts * D * 4)

    while TB > 1 and bytes_needed(TB, TS) > budget:
        TB //= 2
    while TS > sub and bytes_needed(TB, TS) > budget:
        TS = max(sub, _round_up(TS // 2, sub))
    return TB, TS


def positional_encoding_forward(
    x: jnp.ndarray, encoding: jnp.ndarray, *, force_pallas: bool = False
) -> jnp.ndarray:
    """x: (B, S, D); encoding: (max_len, D) float32. Returns x + encoding[:S]."""
    B, S, D = x.shape
    max_len, d_enc = encoding.shape
    assert D == d_enc, f"d_model mismatch: x has {D}, encoding has {d_enc}"
    assert S <= max_len, f"sequence length {S} exceeds max_len {max_len}"

    itemsize = jnp.dtype(x.dtype).itemsize

    # Tiny inputs: launch/pipeline prologue dominates; a fused XLA add wins.
    if not force_pallas and B * S * D * itemsize < 256 * 1024:
        return (x + encoding[None, :S, :]).astype(x.dtype)

    TB, TS = _choose_tiles(B, S, D, itemsize)
    n_s = pl.cdiv(S, TS)   # partial last tile handled by Pallas padding/masking
    n_b = pl.cdiv(B, TB)

    return pl.pallas_call(
        _add_pe_kernel,
        out_shape=jax.ShapeDtypeStruct((B, S, D), x.dtype),
        # Batch axis innermost: PE block index (depends only on s) repeats
        # across consecutive steps -> Pallas skips the redundant PE DMA.
        grid=(n_s, n_b),
        in_specs=[
            # x: TB batch rows x TS sequence rows x full D.
            pl.BlockSpec((TB, TS, D), lambda s, b: (b, s, 0)),
            # PE: tile taken directly from the full (max_len, D) table.
            pl.BlockSpec((TS, D), lambda s, b: (s, 0)),
        ],
        out_specs=pl.BlockSpec((TB, TS, D), lambda s, b: (b, s, 0)),
        compiler_params=pltpu.CompilerParams(
            # Both axes independent -> shardable across TensorCores (v7x).
            dimension_semantics=("parallel", "parallel"),
            vmem_limit_bytes=32 * 1024 * 1024,
        ),
    )(x, encoding)


if __name__ == "__main__":
    key = jax.random.PRNGKey(0)
    encoding = make_positional_encoding(D_MODEL, MAX_LEN)

    # 1) Small shape consistent with the module (batch=2, seq=8, d_model=128).
    #    force_pallas=True so the Pallas kernel itself is exercised.
    B, S = 2, 8
    x_small = jax.random.normal(key, (B, S, D_MODEL), dtype=jnp.float32)
    out_small = jax.block_until_ready(
        positional_encoding_forward(x_small, encoding, force_pallas=True)
    )
    ref_small = x_small + encoding[None, :S, :]
    assert out_small.shape == (B, S, D_MODEL)
    assert out_small.dtype == jnp.float32
    assert jnp.allclose(out_small, ref_small, atol=1e-6), "small-shape mismatch"

    # 2) Medium shape exercising multi-tile grid with partial seq + batch tiles.
    B2, S2 = 5, 2100
    key2 = jax.random.PRNGKey(1)
    x_med = jax.random.normal(key2, (B2, S2, D_MODEL), dtype=jnp.float32)
    out_med = jax.block_until_ready(positional_encoding_forward(x_med, encoding))
    ref_med = x_med + encoding[None, :S2, :]
    assert jnp.allclose(out_med, ref_med, atol=1e-6), "medium-shape mismatch"

    print("KERNEL_OK")
</pallas_src>

<mosaic_0001>
module attributes {stable_mosaic.version = 11 : i64} {
  func.func @_add_pe_kernel(%arg0: i32, %arg1: i32, %arg2: memref<2x8x128xf32, #tpu.memory_space<vmem>>, %arg3: memref<8x128xf32, #tpu.memory_space<vmem>>, %arg4: memref<2x8x128xf32, #tpu.memory_space<vmem>>) attributes {dimension_semantics = [#tpu.dimension_semantics<parallel>, #tpu.dimension_semantics<parallel>], iteration_bounds = array<i64: 1, 1>, scalar_prefetch = 0 : i64, scratch_operands = 0 : i64, tpu.core_type = #tpu.core_type<tc>, window_params = [{transform_indices = @transform_0, window_bounds = array<i64: 2, 8, 128>}, {transform_indices = @transform_1, window_bounds = array<i64: 8, 128>}, {transform_indices = @transform_2, window_bounds = array<i64: 2, 8, 128>}]} {
    %c0 = arith.constant 0 : index
    %c0_0 = arith.constant 0 : index
    %c0_1 = arith.constant 0 : index
    %0 = vector.load %arg2[%c0, %c0_0, %c0_1] : memref<2x8x128xf32, #tpu.memory_space<vmem>>, vector<2x8x128xf32>
    %c0_2 = arith.constant 0 : index
    %c0_3 = arith.constant 0 : index
    %1 = vector.load %arg3[%c0_2, %c0_3] : memref<8x128xf32, #tpu.memory_space<vmem>>, vector<8x128xf32>
    %2 = vector.shape_cast %1 : vector<8x128xf32> to vector<1x8x128xf32>
    %3 = vector.broadcast %2 : vector<1x8x128xf32> to vector<2x8x128xf32>
    %4 = arith.addf %0, %3 : vector<2x8x128xf32>
    %c0_4 = arith.constant 0 : index
    %c0_5 = arith.constant 0 : index
    %c0_6 = arith.constant 0 : index
    %5 = vector.load %arg4[%c0_4, %c0_5, %c0_6] : memref<2x8x128xf32, #tpu.memory_space<vmem>>, vector<2x8x128xf32>
    tpu.vector_store %arg4[%c0_4, %c0_5, %c0_6], %4 {strides = array<i32>} : memref<2x8x128xf32, #tpu.memory_space<vmem>>, vector<2x8x128xf32>,
    return
  }
  func.func @transform_0(%arg0: i32, %arg1: i32) -> (i32, i32, i32) {
    %c0_i32 = arith.constant 0 : i32
    %c0_i32_0 = arith.constant 0 : i32
    return %arg1, %arg0, %c0_i32 : i32, i32, i32
  }
  func.func @transform_1(%arg0: i32, %arg1: i32) -> (i32, i32) {
    %c0_i32 = arith.constant 0 : i32
    %c0_i32_0 = arith.constant 0 : i32
    return %arg0, %c0_i32 : i32, i32
  }
  func.func @transform_2(%arg0: i32, %arg1: i32) -> (i32, i32, i32) {
    %c0_i32 = arith.constant 0 : i32
    %c0_i32_0 = arith.constant 0 : i32
    return %arg1, %arg0, %c0_i32 : i32, i32, i32
  }
}

</mosaic_0001>

<bundles_post_ra>
// kernel: tpu_custom_call.1
= control target key start
LH: loop header
LB: loop body
LE: loop exit
PB: predicated region body
PF: predicated region fallthrough
CT: control target
= control target key end

     0   :  { %7 = vsyncpa [#allocation3], 0  ;;  %s169_s0 = inlined_call_operand.hbm [shape: f32[2,8,128], index: 0, kind: input, shape index: {}]   ;;  %s170_s1 = inlined_call_operand.hbm [shape: f32[5000,128], index: 1, kind: input, shape index: {}]   ;;  %s171_s2 = inlined_call_operand.hbm [shape: f32[2,8,128], index: 2, kind: output, shape index: {}]  }
   0x1   :  { %8 = vsyncpa [#allocation6], 0 }
   0x2   :  { %9 = vsyncpa [#allocation4], 0  ;;  %s134_s9 = smov [#allocation2]  }
   0x3   :  { %s15_s10 = sshll.u32 %s134_s9, 4  ;;  %s16_s10 = int_to_ptr.vmem [resolvable:$true] %s15_s10 }
   0x4   :  { %s76_s11 = scalar_lea.vmem %s16_s10, 256  ;;  %p81_p1 = scmp.lt.s32.totalorder %s16_s10, %s16_s10 }
   0x5   :  { %p77_p0 = scmp.ne.s32.totalorder %s16_s10, %s76_s11  ;;  %p82_p2 = scmp.lt.s32.totalorder %s76_s11, %s76_s11 }
   0x7   :  { %p83_p3 = por %p82_p2, %p81_p1 }
   0x9   :  { %p84_p4 = pnand %p83_p3, %p77_p0 }
   0xb   :  { %87 = shalt.err (!%p84_p4)
}
   0xc   :  { %s135_s12 = smov 128   ;;  %s136_s13 = smov 8  }
   0xd   :  { %21 = dma.hbm_to_vmem [thread:$0]  %s169_s0, 256, %s16_s10, [#allocation3], %s135_s12, %s135_s12, %s136_s13  }
   0xe   :  { %s137_s16 = smov [#allocation5]  }
   0xf   :  { %s28_s17 = sshll.u32 %s137_s16, 4  ;;  %s29_s17 = int_to_ptr.vmem [resolvable:$true] %s28_s17 }
  0x10   :  { %s96_s18 = scalar_lea.vmem %s29_s17, 128  ;;  %p101_p6 = scmp.lt.s32.totalorder %s29_s17, %s29_s17 }
  0x11   :  { %p97_p5 = scmp.ne.s32.totalorder %s29_s17, %s96_s18  ;;  %p102_p7 = scmp.lt.s32.totalorder %s96_s18, %s96_s18 }
  0x13   :  { %p103_p8 = por %p102_p7, %p101_p6 }
  0x15   :  { %p104_p9 = pnand %p103_p8, %p97_p5 }
  0x17   :  { %107 = shalt.err (!%p104_p9)
}
  0x18   :  { %31 = dma.hbm_to_vmem [thread:$0]  %s170_s1, 128, %s29_s17, [#allocation6]  }
  0x19   :  { %128 = dma.done.wait [#allocation3], 256  }
  0x1a   :  { %129 = vsyncadd [#allocation3], 4294967040 }
  0x1b   :  { %130 = dma.done.wait [#allocation6], 128  }
  0x1c   :  { %131 = vsyncadd [#allocation6], 4294967168  ;;  %s138_s21 = smov [#allocation7]   ;;  %v38_v0 = vld [vmem:[#allocation2] sm:$0xff]  ;;  %v40_v1 = vld [vmem:[#allocation5] sm:$0xff] }
  0x1d   :  { %s50_s0 = sshll.u32 %s138_s21, 4  ;;  %v39_v2 = vld [vmem:[#allocation2 + $0x8] sm:$0xff]  ;;  %v41_v3 = vadd.f32 %v40_v1, %v38_v0  ;;  %s51_s0 = int_to_ptr.vmem [resolvable:$true] %s50_s0 }
  0x1e   :  { %v42_v4 = vadd.f32 %v40_v1, %v39_v2  ;;  %s108_s22 = scalar_lea.vmem %s51_s0, 256  ;;  %p113_p11 = scmp.lt.s32.totalorder %s51_s0, %s51_s0 }
  0x1f   :  { %43 = vst [vmem:[#allocation7] sm:$0xff] %v41_v3  ;;  %p109_p10 = scmp.ne.s32.totalorder %s51_s0, %s108_s22  ;;  %p114_p12 = scmp.lt.s32.totalorder %s108_s22, %s108_s22 }
  0x20   :  { %44 = vst [vmem:[#allocation7 + $0x8] sm:$0xff] %v42_v4 }
  0x21   :  { %p115_p13 = por %p114_p12, %p113_p11 }
  0x23   :  { %p116_p0 = pnand %p115_p13, %p109_p10 }
  0x25   :  { %119 = shalt.err (!%p116_p0)
}
  0x26   :  { %56 = dma.vmem_to_hbm [thread:$0]  %s51_s0, 256, %s171_s2, [#allocation4], %s135_s12, %s135_s12, %s136_s13  }
  0x27   :  { %132 = dma.done.wait [#allocation4], 256  }
  0x28   :  { %133 = vsyncadd [#allocation4], 4294967040 }
  0x29   :  { %60 = vsyncpa [#allocation3], 1 }
  0x2a   :  { %61 = vsyncpa [#allocation6], 1 }
  0x2b   :  { %62 = vsyncpa [#allocation4], 1 }

</bundles_post_ra>
